<compile_context>
chip_gen: v7x
topology: tpu7x:2x2x1
jax: 0.10.0
libtpu: 0.0.40
codegen_flags: <defaults>
</compile_context>

<pallas_src>
import functools

import jax
import jax.numpy as jnp
from jax.experimental import pallas as pl
from jax.experimental.pallas import tpu as pltpu


def _attention_kernel(seq_lens_ref,      # scalar-prefetch: [B] int32 (SMEM)
                      x_ref,             # [bb, S, D_in]
                      wqkv_ref,          # [D_in, 3*H*D_out]   (Q | K | V, head-major cols)
                      bqkv_ref,          # [1, 3*H*D_out]
                      o_ref,             # [bb, S, H*D_out]
                      *, batch_block, seq_len, n_heads, d_out):
    hd = n_heads * d_out
    b0 = pl.program_id(0) * batch_block          # absolute batch offset of this block

    # One fused projection for every batch row, head and Q/K/V.
    # [bb, S, D_in] -> [bb*S, D_in] is a free sublane merge (same VMEM layout).
    x_all = x_ref[...].reshape(batch_block * seq_len, -1)
    qkv = jnp.dot(x_all, wqkv_ref[...],
                  preferred_element_type=jnp.float32) + bqkv_ref[0]   # [bb*S, 3*HD]

    inv_scale = 1.0 / (float(d_out) ** 0.5)
    q_all = jax.nn.sigmoid(qkv[:, 0:hd]) * inv_scale        # scale folded into Q
    k_all = jax.nn.sigmoid(qkv[:, hd:2 * hd])
    v_all = qkv[:, 2 * hd:3 * hd]

    # Validity iotas hoisted out of the loops (JAX does not CSE broadcasts).
    col_iota = jax.lax.broadcasted_iota(jnp.int32, (seq_len, seq_len), 1)
    row_iota = jax.lax.broadcasted_iota(jnp.int32, (seq_len, 1), 0)

    for b in range(batch_block):                 # static, tiny
        n_valid = seq_lens_ref[b0 + b]
        col_valid = (col_iota < n_valid).astype(jnp.float32)   # [S, S]
        row_valid = (row_iota < n_valid).astype(jnp.float32)   # [S, 1]
        r0 = b * seq_len

        for h in range(n_heads):                 # static, tiny
            s0 = h * d_out
            q = q_all[r0:r0 + seq_len, s0:s0 + d_out]
            k = k_all[r0:r0 + seq_len, s0:s0 + d_out]
            v = v_all[r0:r0 + seq_len, s0:s0 + d_out]

            # Q @ K^T without materializing a transpose of K.
            scores = jax.lax.dot_general(q, k, (((1,), (1,)), ((), ())),
                                         preferred_element_type=jnp.float32)  # [S, S]

            # exp-then-mask-then-normalize, exactly as the PyTorch module does.
            w = jnp.exp(scores) * col_valid
            inv = pl.reciprocal(jnp.sum(w, axis=-1, keepdims=True) + 1e-8,
                                approx=False)
            w = w * inv   # scaling the [S,S] matrix beats scaling [S,D_out] while S < D_out

            # Head result stored straight into its output column slice (no concat);
            # padded rows zeroed — equivalent to the reference's outer-product mask.
            o_ref[b, :, s0:s0 + d_out] = (
                jnp.dot(w, v, preferred_element_type=jnp.float32) * row_valid)


def attention_layer(x_text, seq_lens, wq, bq, wk, bk, wv, bv, *, batch_block=None):
    """x_text: [B, S, D_in] f32, seq_lens: [B] int32, weights stacked over heads.

    wq/wk/wv: [H, D_in, D_out], bq/bk/bv: [H, D_out].
    Returns [B, S, H*D_out] (heads concatenated along the last dim, like torch.cat).

    batch_block: batch rows per grid step.  Default = B -> a single grid step
    (best on single-TC v5e / v6e).  On v7x with larger batches use
    batch_block = B // 2 so the "parallel" grid axis puts one step on each TC.
    """
    B, S, D_in = x_text.shape
    H, _, D_out = wq.shape
    HD = H * D_out

    if batch_block is None:
        batch_block = B
    assert B % batch_block == 0
    n_steps = B // batch_block

    # Fuse heads + Q/K/V into one weight matrix (one-time parameter prep).
    def _fuse(w):  # [H, D_in, D_out] -> [D_in, H*D_out], head-major columns
        return jnp.transpose(w, (1, 0, 2)).reshape(D_in, HD)

    wqkv = jnp.concatenate([_fuse(wq), _fuse(wk), _fuse(wv)], axis=-1)         # [D_in, 3*HD]
    bqkv = jnp.concatenate([bq.reshape(HD), bk.reshape(HD), bv.reshape(HD)])[None, :]

    kernel = functools.partial(_attention_kernel,
                               batch_block=batch_block, seq_len=S,
                               n_heads=H, d_out=D_out)

    out = pl.pallas_call(
        kernel,
        out_shape=jax.ShapeDtypeStruct((B, S, HD), jnp.float32),
        grid_spec=pltpu.PrefetchScalarGridSpec(
            num_scalar_prefetch=1,                       # seq_lens -> SMEM
            grid=(n_steps,),
            in_specs=[
                pl.BlockSpec((batch_block, S, D_in), lambda i, sl: (i, 0, 0)),  # x
                pl.BlockSpec((D_in, 3 * HD),         lambda i, sl: (0, 0)),     # fused Wqkv
                pl.BlockSpec((1, 3 * HD),            lambda i, sl: (0, 0)),     # fused bias
            ],
            out_specs=pl.BlockSpec((batch_block, S, HD), lambda i, sl: (i, 0, 0)),
        ),
        compiler_params=pltpu.CompilerParams(
            dimension_semantics=("parallel",)),
    )(seq_lens, x_text, wqkv, bqkv)

    return out


def _reference(x_text, seq_lens, wq, bq, wk, bk, wv, bv):
    """Pure-JAX reference replicating the PyTorch forward."""
    B, S, _ = x_text.shape
    H, _, D_out = wq.shape
    outs = []
    for h in range(H):
        q = jax.nn.sigmoid(x_text @ wq[h] + bq[h])
        k = jax.nn.sigmoid(x_text @ wk[h] + bk[h])
        v = x_text @ wv[h] + bv[h]
        valid = (jnp.arange(S)[None, :] < seq_lens[:, None]).astype(jnp.float32)  # [B,S]
        mask = valid[:, :, None] * valid[:, None, :]                              # [B,S,S]
        w = jnp.exp(jnp.einsum("bsd,btd->bst", q, k) / jnp.sqrt(jnp.float32(D_out))) * mask
        w = w / (jnp.sum(w, axis=-1, keepdims=True) + 1e-8)
        outs.append(jnp.einsum("bst,btd->bsd", w, v))
    return jnp.concatenate(outs, axis=-1)


if __name__ == "__main__":
    # Small shapes consistent with the module: multi_head_num=2, input_features=32,
    # output_features=32, batch=2, seq_len=8.
    B, S, D_in, D_out, H = 2, 8, 32, 32, 2

    key = jax.random.PRNGKey(0)
    kx, kq, kbq, kk, kbk, kv, kbv = jax.random.split(key, 7)

    x_text = jax.random.normal(kx, (B, S, D_in), dtype=jnp.float32)
    seq_lens = jnp.array([8, 5], dtype=jnp.int32)

    scale = 1.0 / jnp.sqrt(jnp.float32(D_in))
    wq = jax.random.normal(kq,  (H, D_in, D_out), dtype=jnp.float32) * scale
    bq = jax.random.normal(kbq, (H, D_out),       dtype=jnp.float32) * 0.1
    wk = jax.random.normal(kk,  (H, D_in, D_out), dtype=jnp.float32) * scale
    bk = jax.random.normal(kbk, (H, D_out),       dtype=jnp.float32) * 0.1
    wv = jax.random.normal(kv,  (H, D_in, D_out), dtype=jnp.float32) * scale
    bv = jax.random.normal(kbv, (H, D_out),       dtype=jnp.float32) * 0.1

    out = attention_layer(x_text, seq_lens, wq, bq, wk, bk, wv, bv)
    out = jax.block_until_ready(out)

    ref = _reference(x_text, seq_lens, wq, bq, wk, bk, wv, bv)
    assert out.shape == (B, S, H * D_out)
    assert jnp.allclose(out, ref, atol=1e-5, rtol=1e-5)

    print("KERNEL_OK")
</pallas_src>

<mosaic_0001>
module attributes {stable_mosaic.version = 11 : i64} {
  func.func @_attention_kernel(%arg0: i32, %arg1: memref<2xi32, #tpu.memory_space<smem>>, %arg2: memref<2x8x32xf32, #tpu.memory_space<vmem>>, %arg3: memref<32x192xf32, #tpu.memory_space<vmem>>, %arg4: memref<1x192xf32, #tpu.memory_space<vmem>>, %arg5: memref<2x8x64xf32, #tpu.memory_space<vmem>>) attributes {dimension_semantics = [#tpu.dimension_semantics<parallel>], iteration_bounds = array<i64: 1>, scalar_prefetch = 1 : i64, scratch_operands = 0 : i64, tpu.core_type = #tpu.core_type<tc>, window_params = [{transform_indices = @transform_0, window_bounds = array<i64: 2, 8, 32>}, {pipeline_mode = #tpu.pipeline_mode<synchronous>, transform_indices = @transform_1, window_bounds = array<i64: 32, 192>}, {pipeline_mode = #tpu.pipeline_mode<synchronous>, transform_indices = @transform_2, window_bounds = array<i64: 1, 192>}, {transform_indices = @transform_3, window_bounds = array<i64: 2, 8, 64>}]} {
    %c2_i32 = arith.constant 2 : i32
    %0 = arith.muli %arg0, %c2_i32 : i32
    %c0 = arith.constant 0 : index
    %c0_0 = arith.constant 0 : index
    %c0_1 = arith.constant 0 : index
    %1 = vector.load %arg2[%c0, %c0_0, %c0_1] : memref<2x8x32xf32, #tpu.memory_space<vmem>>, vector<2x8x32xf32>
    %2 = vector.shape_cast %1 : vector<2x8x32xf32> to vector<16x32xf32>
    %c0_2 = arith.constant 0 : index
    %c0_3 = arith.constant 0 : index
    %3 = vector.load %arg3[%c0_2, %c0_3] : memref<32x192xf32, #tpu.memory_space<vmem>>, vector<32x192xf32>
    %cst = arith.constant dense<0.000000e+00> : vector<16x192xf32>
    %4 = tpu.matmul %2, %3, %cst {dimension_numbers = #tpu.dot_dimension_numbers<[1], [0], [0], [1], [0, 0, 1, 1], [], []>} : vector<16x32xf32>, vector<32x192xf32>, vector<16x192xf32> -> vector<16x192xf32>
    %c0_4 = arith.constant 0 : index
    %c0_5 = arith.constant 0 : index
    %5 = vector.load %arg4[%c0_4, %c0_5] : memref<1x192xf32, #tpu.memory_space<vmem>>, vector<1x192xf32>
    %6 = vector.shape_cast %5 : vector<1x192xf32> to vector<192xf32>
    %7 = vector.shape_cast %6 : vector<192xf32> to vector<1x192xf32>
    %8 = vector.broadcast %7 : vector<1x192xf32> to vector<16x192xf32>
    %9 = arith.addf %4, %8 : vector<16x192xf32>
    %10 = vector.extract_strided_slice %9 {offsets = [0, 0], sizes = [16, 64], strides = [1, 1]} : vector<16x192xf32> to vector<16x64xf32>
    %11 = arith.negf %10 : vector<16x64xf32>
    %12 = math.exp %11 : vector<16x64xf32>
    %cst_6 = arith.constant 1.000000e+00 : f32
    %13 = vector.broadcast %cst_6 : f32 to vector<16x64xf32>
    %14 = arith.addf %13, %12 : vector<16x64xf32>
    %15 = arith.divf %13, %14 : vector<16x64xf32>
    %cst_7 = arith.constant 0.176776692 : f32
    %16 = vector.broadcast %cst_7 : f32 to vector<16x64xf32>
    %17 = arith.mulf %15, %16 : vector<16x64xf32>
    %18 = vector.extract_strided_slice %9 {offsets = [0, 64], sizes = [16, 64], strides = [1, 1]} : vector<16x192xf32> to vector<16x64xf32>
    %19 = arith.negf %18 : vector<16x64xf32>
    %20 = math.exp %19 : vector<16x64xf32>
    %cst_8 = arith.constant 1.000000e+00 : f32
    %21 = vector.broadcast %cst_8 : f32 to vector<16x64xf32>
    %22 = arith.addf %21, %20 : vector<16x64xf32>
    %23 = arith.divf %21, %22 : vector<16x64xf32>
    %24 = vector.extract_strided_slice %9 {offsets = [0, 128], sizes = [16, 64], strides = [1, 1]} : vector<16x192xf32> to vector<16x64xf32>
    %25 = tpu.iota {dimensions = array<i32: 1>} : vector<8x8xi32>
    %26 = tpu.iota {dimensions = array<i32: 0>} : vector<8x1xi32>
    %c0_i32 = arith.constant 0 : i32
    %27 = arith.addi %0, %c0_i32 : i32
    %28 = arith.index_cast %27 : i32 to index
    %29 = memref.load %arg1[%28] : memref<2xi32, #tpu.memory_space<smem>>
    %30 = vector.broadcast %29 : i32 to vector<8x8xi32>
    %31 = arith.cmpi slt, %25, %30 : vector<8x8xi32>
    %32 = arith.extui %31 : vector<8x8xi1> to vector<8x8xi32>
    %33 = arith.sitofp %32 : vector<8x8xi32> to vector<8x8xf32>
    %34 = vector.broadcast %29 : i32 to vector<8x1xi32>
    %35 = arith.cmpi slt, %26, %34 : vector<8x1xi32>
    %36 = arith.extui %35 : vector<8x1xi1> to vector<8x1xi32>
    %37 = arith.sitofp %36 : vector<8x1xi32> to vector<8x1xf32>
    %38 = vector.extract_strided_slice %17 {offsets = [0, 0], sizes = [8, 32], strides = [1, 1]} : vector<16x64xf32> to vector<8x32xf32>
    %39 = vector.extract_strided_slice %23 {offsets = [0, 0], sizes = [8, 32], strides = [1, 1]} : vector<16x64xf32> to vector<8x32xf32>
    %40 = vector.extract_strided_slice %24 {offsets = [0, 0], sizes = [8, 32], strides = [1, 1]} : vector<16x64xf32> to vector<8x32xf32>
    %cst_9 = arith.constant dense<0.000000e+00> : vector<8x8xf32>
    %41 = tpu.matmul %38, %39, %cst_9 {dimension_numbers = #tpu.dot_dimension_numbers<[1], [1], [0], [0], [0, 0, 1, 0], [], []>} : vector<8x32xf32>, vector<8x32xf32>, vector<8x8xf32> -> vector<8x8xf32>
    %42 = math.exp %41 : vector<8x8xf32>
    %43 = arith.mulf %42, %33 : vector<8x8xf32>
    %cst_10 = arith.constant dense<0.000000e+00> : vector<8xf32>
    %44 = vector.multi_reduction <add>, %43, %cst_10 [1] : vector<8x8xf32> to vector<8xf32>
    %45 = vector.shape_cast %44 : vector<8xf32> to vector<8x1xf32>
    %cst_11 = arith.constant 9.99999993E-9 : f32
    %46 = vector.broadcast %cst_11 : f32 to vector<8x1xf32>
    %47 = arith.addf %45, %46 : vector<8x1xf32>
    %48 = tpu.reciprocal %47 : vector<8x1xf32> -> vector<8x1xf32>
    %49 = vector.broadcast %48 : vector<8x1xf32> to vector<8x8xf32>
    %50 = arith.mulf %43, %49 : vector<8x8xf32>
    %cst_12 = arith.constant dense<0.000000e+00> : vector<8x32xf32>
    %51 = tpu.matmul %50, %40, %cst_12 {dimension_numbers = #tpu.dot_dimension_numbers<[1], [0], [0], [1], [0, 0, 1, 1], [], []>} : vector<8x8xf32>, vector<8x32xf32>, vector<8x32xf32> -> vector<8x32xf32>
    %52 = vector.broadcast %37 : vector<8x1xf32> to vector<8x32xf32>
    %53 = arith.mulf %51, %52 : vector<8x32xf32>
    %c0_13 = arith.constant 0 : index
    %c0_14 = arith.constant 0 : index
    %c0_15 = arith.constant 0 : index
    %54 = vector.load %arg5[%c0_13, %c0_14, %c0_15] : memref<2x8x64xf32, #tpu.memory_space<vmem>>, vector<1x8x32xf32>
    %55 = vector.shape_cast %54 : vector<1x8x32xf32> to vector<8x32xf32>
    %56 = vector.shape_cast %53 : vector<8x32xf32> to vector<1x8x32xf32>
    tpu.vector_store %arg5[%c0_13, %c0_14, %c0_15], %56 {strides = array<i32>} : memref<2x8x64xf32, #tpu.memory_space<vmem>>, vector<1x8x32xf32>,
    %57 = vector.extract_strided_slice %17 {offsets = [0, 32], sizes = [8, 32], strides = [1, 1]} : vector<16x64xf32> to vector<8x32xf32>
    %58 = vector.extract_strided_slice %23 {offsets = [0, 32], sizes = [8, 32], strides = [1, 1]} : vector<16x64xf32> to vector<8x32xf32>
    %59 = vector.extract_strided_slice %24 {offsets = [0, 32], sizes = [8, 32], strides = [1, 1]} : vector<16x64xf32> to vector<8x32xf32>
    %cst_16 = arith.constant dense<0.000000e+00> : vector<8x8xf32>
    %60 = tpu.matmul %57, %58, %cst_16 {dimension_numbers = #tpu.dot_dimension_numbers<[1], [1], [0], [0], [0, 0, 1, 0], [], []>} : vector<8x32xf32>, vector<8x32xf32>, vector<8x8xf32> -> vector<8x8xf32>
    %61 = math.exp %60 : vector<8x8xf32>
    %62 = arith.mulf %61, %33 : vector<8x8xf32>
    %cst_17 = arith.constant dense<0.000000e+00> : vector<8xf32>
    %63 = vector.multi_reduction <add>, %62, %cst_17 [1] : vector<8x8xf32> to vector<8xf32>
    %64 = vector.shape_cast %63 : vector<8xf32> to vector<8x1xf32>
    %cst_18 = arith.constant 9.99999993E-9 : f32
    %65 = vector.broadcast %cst_18 : f32 to vector<8x1xf32>
    %66 = arith.addf %64, %65 : vector<8x1xf32>
    %67 = tpu.reciprocal %66 : vector<8x1xf32> -> vector<8x1xf32>
    %68 = vector.broadcast %67 : vector<8x1xf32> to vector<8x8xf32>
    %69 = arith.mulf %62, %68 : vector<8x8xf32>
    %cst_19 = arith.constant dense<0.000000e+00> : vector<8x32xf32>
    %70 = tpu.matmul %69, %59, %cst_19 {dimension_numbers = #tpu.dot_dimension_numbers<[1], [0], [0], [1], [0, 0, 1, 1], [], []>} : vector<8x8xf32>, vector<8x32xf32>, vector<8x32xf32> -> vector<8x32xf32>
    %71 = vector.broadcast %37 : vector<8x1xf32> to vector<8x32xf32>
    %72 = arith.mulf %70, %71 : vector<8x32xf32>
    %c0_20 = arith.constant 0 : index
    %c0_21 = arith.constant 0 : index
    %c32 = arith.constant 32 : index
    %73 = vector.load %arg5[%c0_20, %c0_21, %c32] : memref<2x8x64xf32, #tpu.memory_space<vmem>>, vector<1x8x32xf32>
    %74 = vector.shape_cast %73 : vector<1x8x32xf32> to vector<8x32xf32>
    %75 = vector.shape_cast %72 : vector<8x32xf32> to vector<1x8x32xf32>
    tpu.vector_store %arg5[%c0_20, %c0_21, %c32], %75 {strides = array<i32>} : memref<2x8x64xf32, #tpu.memory_space<vmem>>, vector<1x8x32xf32>,
    %c1_i32 = arith.constant 1 : i32
    %76 = arith.addi %0, %c1_i32 : i32
    %77 = arith.index_cast %76 : i32 to index
    %78 = memref.load %arg1[%77] : memref<2xi32, #tpu.memory_space<smem>>
    %79 = vector.broadcast %78 : i32 to vector<8x8xi32>
    %80 = arith.cmpi slt, %25, %79 : vector<8x8xi32>
    %81 = arith.extui %80 : vector<8x8xi1> to vector<8x8xi32>
    %82 = arith.sitofp %81 : vector<8x8xi32> to vector<8x8xf32>
    %83 = vector.broadcast %78 : i32 to vector<8x1xi32>
    %84 = arith.cmpi slt, %26, %83 : vector<8x1xi32>
    %85 = arith.extui %84 : vector<8x1xi1> to vector<8x1xi32>
    %86 = arith.sitofp %85 : vector<8x1xi32> to vector<8x1xf32>
    %87 = vector.extract_strided_slice %17 {offsets = [8, 0], sizes = [8, 32], strides = [1, 1]} : vector<16x64xf32> to vector<8x32xf32>
    %88 = vector.extract_strided_slice %23 {offsets = [8, 0], sizes = [8, 32], strides = [1, 1]} : vector<16x64xf32> to vector<8x32xf32>
    %89 = vector.extract_strided_slice %24 {offsets = [8, 0], sizes = [8, 32], strides = [1, 1]} : vector<16x64xf32> to vector<8x32xf32>
    %cst_22 = arith.constant dense<0.000000e+00> : vector<8x8xf32>
    %90 = tpu.matmul %87, %88, %cst_22 {dimension_numbers = #tpu.dot_dimension_numbers<[1], [1], [0], [0], [0, 0, 1, 0], [], []>} : vector<8x32xf32>, vector<8x32xf32>, vector<8x8xf32> -> vector<8x8xf32>
    %91 = math.exp %90 : vector<8x8xf32>
    %92 = arith.mulf %91, %82 : vector<8x8xf32>
    %cst_23 = arith.constant dense<0.000000e+00> : vector<8xf32>
    %93 = vector.multi_reduction <add>, %92, %cst_23 [1] : vector<8x8xf32> to vector<8xf32>
    %94 = vector.shape_cast %93 : vector<8xf32> to vector<8x1xf32>
    %cst_24 = arith.constant 9.99999993E-9 : f32
    %95 = vector.broadcast %cst_24 : f32 to vector<8x1xf32>
    %96 = arith.addf %94, %95 : vector<8x1xf32>
    %97 = tpu.reciprocal %96 : vector<8x1xf32> -> vector<8x1xf32>
    %98 = vector.broadcast %97 : vector<8x1xf32> to vector<8x8xf32>
    %99 = arith.mulf %92, %98 : vector<8x8xf32>
    %cst_25 = arith.constant dense<0.000000e+00> : vector<8x32xf32>
    %100 = tpu.matmul %99, %89, %cst_25 {dimension_numbers = #tpu.dot_dimension_numbers<[1], [0], [0], [1], [0, 0, 1, 1], [], []>} : vector<8x8xf32>, vector<8x32xf32>, vector<8x32xf32> -> vector<8x32xf32>
    %101 = vector.broadcast %86 : vector<8x1xf32> to vector<8x32xf32>
    %102 = arith.mulf %100, %101 : vector<8x32xf32>
    %c1 = arith.constant 1 : index
    %c0_26 = arith.constant 0 : index
    %c0_27 = arith.constant 0 : index
    %103 = vector.load %arg5[%c1, %c0_26, %c0_27] : memref<2x8x64xf32, #tpu.memory_space<vmem>>, vector<1x8x32xf32>
    %104 = vector.shape_cast %103 : vector<1x8x32xf32> to vector<8x32xf32>
    %105 = vector.shape_cast %102 : vector<8x32xf32> to vector<1x8x32xf32>
    tpu.vector_store %arg5[%c1, %c0_26, %c0_27], %105 {strides = array<i32>} : memref<2x8x64xf32, #tpu.memory_space<vmem>>, vector<1x8x32xf32>,
    %106 = vector.extract_strided_slice %17 {offsets = [8, 32], sizes = [8, 32], strides = [1, 1]} : vector<16x64xf32> to vector<8x32xf32>
    %107 = vector.extract_strided_slice %23 {offsets = [8, 32], sizes = [8, 32], strides = [1, 1]} : vector<16x64xf32> to vector<8x32xf32>
    %108 = vector.extract_strided_slice %24 {offsets = [8, 32], sizes = [8, 32], strides = [1, 1]} : vector<16x64xf32> to vector<8x32xf32>
    %cst_28 = arith.constant dense<0.000000e+00> : vector<8x8xf32>
    %109 = tpu.matmul %106, %107, %cst_28 {dimension_numbers = #tpu.dot_dimension_numbers<[1], [1], [0], [0], [0, 0, 1, 0], [], []>} : vector<8x32xf32>, vector<8x32xf32>, vector<8x8xf32> -> vector<8x8xf32>
    %110 = math.exp %109 : vector<8x8xf32>
    %111 = arith.mulf %110, %82 : vector<8x8xf32>
    %cst_29 = arith.constant dense<0.000000e+00> : vector<8xf32>
    %112 = vector.multi_reduction <add>, %111, %cst_29 [1] : vector<8x8xf32> to vector<8xf32>
    %113 = vector.shape_cast %112 : vector<8xf32> to vector<8x1xf32>
    %cst_30 = arith.constant 9.99999993E-9 : f32
    %114 = vector.broadcast %cst_30 : f32 to vector<8x1xf32>
    %115 = arith.addf %113, %114 : vector<8x1xf32>
    %116 = tpu.reciprocal %115 : vector<8x1xf32> -> vector<8x1xf32>
    %117 = vector.broadcast %116 : vector<8x1xf32> to vector<8x8xf32>
    %118 = arith.mulf %111, %117 : vector<8x8xf32>
    %cst_31 = arith.constant dense<0.000000e+00> : vector<8x32xf32>
    %119 = tpu.matmul %118, %108, %cst_31 {dimension_numbers = #tpu.dot_dimension_numbers<[1], [0], [0], [1], [0, 0, 1, 1], [], []>} : vector<8x8xf32>, vector<8x32xf32>, vector<8x32xf32> -> vector<8x32xf32>
    %120 = vector.broadcast %86 : vector<8x1xf32> to vector<8x32xf32>
    %121 = arith.mulf %119, %120 : vector<8x32xf32>
    %c1_32 = arith.constant 1 : index
    %c0_33 = arith.constant 0 : index
    %c32_34 = arith.constant 32 : index
    %122 = vector.load %arg5[%c1_32, %c0_33, %c32_34] : memref<2x8x64xf32, #tpu.memory_space<vmem>>, vector<1x8x32xf32>
    %123 = vector.shape_cast %122 : vector<1x8x32xf32> to vector<8x32xf32>
    %124 = vector.shape_cast %121 : vector<8x32xf32> to vector<1x8x32xf32>
    tpu.vector_store %arg5[%c1_32, %c0_33, %c32_34], %124 {strides = array<i32>} : memref<2x8x64xf32, #tpu.memory_space<vmem>>, vector<1x8x32xf32>,
    return
  }
  func.func @transform_0(%arg0: i32, %arg1: memref<2xi32, #tpu.memory_space<smem>>) -> (i32, i32, i32) {
    %c0_i32 = arith.constant 0 : i32
    %c0_i32_0 = arith.constant 0 : i32
    %c0_i32_1 = arith.constant 0 : i32
    return %arg0, %c0_i32, %c0_i32_0 : i32, i32, i32
  }
  func.func @transform_1(%arg0: i32, %arg1: memref<2xi32, #tpu.memory_space<smem>>) -> (i32, i32) {
    %c0_i32 = arith.constant 0 : i32
    %c0_i32_0 = arith.constant 0 : i32
    %c0_i32_1 = arith.constant 0 : i32
    return %c0_i32, %c0_i32_0 : i32, i32
  }
  func.func @transform_2(%arg0: i32, %arg1: memref<2xi32, #tpu.memory_space<smem>>) -> (i32, i32) {
    %c0_i32 = arith.constant 0 : i32
    %c0_i32_0 = arith.constant 0 : i32
    %c0_i32_1 = arith.constant 0 : i32
    return %c0_i32, %c0_i32_0 : i32, i32
  }
  func.func @transform_3(%arg0: i32, %arg1: memref<2xi32, #tpu.memory_space<smem>>) -> (i32, i32, i32) {
    %c0_i32 = arith.constant 0 : i32
    %c0_i32_0 = arith.constant 0 : i32
    %c0_i32_1 = arith.constant 0 : i32
    return %arg0, %c0_i32, %c0_i32_0 : i32, i32, i32
  }
}

</mosaic_0001>

<bundles_post_ra>
// kernel: tpu_custom_call.1
= control target key start
LH: loop header
LB: loop body
LE: loop exit
PB: predicated region body
PF: predicated region fallthrough
CT: control target
= control target key end

     0   :  { %s1261_s0 = inlined_call_operand.hbm [shape: s32[2], index: 0, kind: input, shape index: {}]   ;;  %s1262_s1 = inlined_call_operand.hbm [shape: f32[2,8,32], index: 1, kind: input, shape index: {}]   ;;  %s1263_s2 = inlined_call_operand.hbm [shape: f32[32,192], index: 2, kind: input, shape index: {}]   ;;  %s1264_s3 = inlined_call_operand.vmem [shape: f32[1,192], index: 3, kind: input, shape index: {}]   ;;  %s1265_s4 = inlined_call_operand.hbm [shape: f32[2,8,64], index: 4, kind: output, shape index: {}]  }
   0x1   :  { %s997_s17 = scalar_lea.hbm %s1261_s0, 16 }
   0x2   :  { %p998_p0 = scmp.ne.s32.totalorder %s1261_s0, %s997_s17  ;;  %p1001_p1 = scmp.lt.u32.totalorder %s997_s17, %s1261_s0 }
   0x4   :  { %p1003_p2 = pnand %p1001_p1, %p998_p0 }
   0x6   :  { %1006 = shalt.err (!%p1003_p2)  }
   0x7   :  { %s1081_s22 = smov [#allocation3]  }
   0x8   :  { %10 = dma.hbm_to_smem %s1261_s0, 16, %s1081_s22, [#allocation2] }
   0x9   :  { %1073 = dma.done.wait [#allocation2], 16 }
   0xa   :  { %1074 = vsyncadd [#allocation2], 4294967280 }
   0xb   :  { %12 = sfence }
   0xc   :  { %13 = vsyncpa [#allocation5], 0 }
   0xd   :  { %14 = vsyncpa [#allocation8], 0 }
   0xe   :  { %15 = vsyncpa [#allocation6], 0  ;;  %s1082_s25 = smov [#allocation4]   ;;  %s1007_s29 = scalar_lea.hbm %s1262_s1, 256 }
   0xf   :  { %s21_s26 = sshll.u32 %s1082_s25, 4  ;;  %p1008_p3 = scmp.ne.s32.totalorder %s1262_s1, %s1007_s29  ;;  %s22_s26 = int_to_ptr.vmem [resolvable:$true] %s21_s26 }
  0x10   :  { %p1011_p4 = scmp.lt.u32.totalorder %s1007_s29, %s1262_s1 }
  0x12   :  { %p1013_p5 = pnand %p1011_p4, %p1008_p3 }
  0x14   :  { %1016 = shalt.err (!%p1013_p5)
}
  0x15   :  { %s1017_s0 = scalar_lea.vmem %s22_s26, 256  ;;  %p1022_p7 = scmp.lt.s32.totalorder %s22_s26, %s22_s26 }
  0x16   :  { %p1018_p6 = scmp.ne.s32.totalorder %s22_s26, %s1017_s0  ;;  %p1023_p8 = scmp.lt.s32.totalorder %s1017_s0, %s1017_s0 }
  0x18   :  { %p1024_p9 = por %p1023_p8, %p1022_p7 }
  0x1a   :  { %p1025_p10 = pnand %p1024_p9, %p1018_p6 }
  0x1c   :  { %1028 = shalt.err (!%p1025_p10)
}
  0x1d   :  { %s1083_s8 = smov 128   ;;  %s1084_s9 = smov 8  }
  0x1e   :  { %27 = dma.hbm_to_vmem [thread:$0]  %s1262_s1, 256, %s22_s26, [#allocation5], %s1083_s8, %s1083_s8, %s1084_s9  }
  0x1f   :  { %s1085_s12 = smov [#allocation7]   ;;  %s1029_s16 = scalar_lea.hbm %s1263_s2, 1024 }
  0x20   :  { %s33_s13 = sshll.u32 %s1085_s12, 4  ;;  %p1030_p11 = scmp.ne.s32.totalorder %s1263_s2, %s1029_s16  ;;  %s34_s13 = int_to_ptr.vmem [resolvable:$true] %s33_s13 }
  0x21   :  { %p1033_p12 = scmp.lt.u32.totalorder %s1029_s16, %s1263_s2 }
  0x23   :  { %p1035_p13 = pnand %p1033_p12, %p1030_p11 }
  0x25   :  { %1038 = shalt.err (!%p1035_p13)
}
  0x26   :  { %s1039_s21 = scalar_lea.vmem %s34_s13, 1024  ;;  %p1044_p1 = scmp.lt.s32.totalorder %s34_s13, %s34_s13 }
  0x27   :  { %p1040_p0 = scmp.ne.s32.totalorder %s34_s13, %s1039_s21  ;;  %p1045_p2 = scmp.lt.s32.totalorder %s1039_s21, %s1039_s21 }
  0x29   :  { %p1046_p3 = por %p1045_p2, %p1044_p1 }
  0x2b   :  { %p1047_p4 = pnand %p1046_p3, %p1040_p0 }
  0x2d   :  { %1050 = shalt.err (!%p1047_p4)
}
  0x2e   :  { %s1086_s1 = smov 256   ;;  %s1087_s22 = smov 16  }
  0x2f   :  { %39 = dma.hbm_to_vmem [thread:$0]  %s1263_s2, 1024, %s34_s13, [#allocation8], %s1086_s1, %s1086_s1, %s1087_s22  }
  0x30   :  { %1075 = dma.done.wait [#allocation5], 256  }
  0x31   :  { %1076 = vsyncadd [#allocation5], 4294967040 }
  0x32   :  { %1077 = dma.done.wait [#allocation8], 1024  }
  0x33   :  { %1078 = vsyncadd [#allocation8], 4294966272  ;;  %v1088_v0 = vmov 0.0   ;;  %v52_v1 = vld [vmem:[#allocation7 + $0x8] sm:$0xff]  ;;  %v54_v2 = vld [vmem:[#allocation7 + $0x18] sm:$0xff]  ;;  %vm71_vm0 = vcmask 261120   ;;  %v61_v14 = vlaneseq }
  0x34   :  { %142 = vmatprep.mubr.f32.mxu0 %v1088_v0  ;;  %912 = vmatprep.subr.mxu1 %v1088_v0  ;;  %v51_v3 = vld [vmem:[#allocation7] sm:$0xff]  ;;  %v952_v4 = vpack.c.bf16 %v54_v2, %v52_v1  ;;  %v53_v5 = vld [vmem:[#allocation7 + $0x10] sm:$0xff]  ;;  %v56_v6 = vld [vmem:[#allocation7 + $0x28] sm:$0xff]  ;;  %vm1089_vm1 = vmmov 0   ;;  %s1091_s26 = smov 64   ;;  %s1092_s27 = smov 96  }
  0x35   :  { %v58_v7 = vld [vmem:[#allocation7 + $0x38] sm:$0xff]  ;;  %v954_v8 = vpack.c.bf16 %v53_v5, %v51_v3  ;;  %v55_v10 = vld [vmem:[#allocation7 + $0x20] sm:$0xff]  ;;  %v57_v11 = vld [vmem:[#allocation7 + $0x30] sm:$0xff]  ;;  %v1163_v15 = vshrl.u32 %v61_v14, 7  ;;  %914 = vmatprep.mubr.msk.f32.mxu1 %vm1089_vm1, %v1088_v0  ;;  %s1193_s28 = sld [smem:[#allocation3]]  ;;  %v170_v43 = vand.u32 127, %v61_v14 }
  0x36   :  { %v956_v9 = vpack.c.bf16 %v58_v7, %v56_v6  ;;  %953 = vmatprep.subr.bf16.mxu0 %v952_v4  ;;  %v958_v12 = vpack.c.bf16 %v57_v11, %v55_v10  ;;  %v49_v13 = vld [vmem:[#allocation4] sm:$0xff]  ;;  %v59_v17 = vld [vmem:[%s1264_s3] sm:$0x3]  ;;  %v50_v25 = vld [vmem:[#allocation4 + $0x8] sm:$0xff]  ;;  %s1090_s3 = smov 32   ;;  %vm262_vm3 = vcmask 64512  }
  0x37   :  { %955 = vmatpush1.bf16.msra.mxu0 %v954_v8  ;;  %v63_v16 = vsub.s32 0, %v1163_v15  ;;  %v67_v28 = vsub.s32 1, %v1163_v15  ;;  %s1219_s29 = sld [smem:[#allocation3 + $0x1]]  ;;  %vm513_vm7 = vcmask 523520   ;;  %s1093_s30 = smov [#allocation9]  }
  0x38   :  { %957 = vmatprep.subr.bf16.mxu0 %v956_v9  ;;  %s862_s5 = sshll.u32 %s1093_s30, 4  ;;  %s863_s5 = int_to_ptr.vmem [resolvable:$true] %s862_s5 }
  0x39   :  { %v64_v18 = vrot.slane %v59_v17, %v63_v16  ;;  %v1177_v29 = vrot.slane %v59_v17, %v67_v28  ;;  %s1051_s6 = scalar_lea.vmem %s863_s5, 256  ;;  %p1056_p6 = scmp.lt.s32.totalorder %s863_s5, %s863_s5 }
  0x3a   :  { %p1052_p5 = scmp.ne.s32.totalorder %s863_s5, %s1051_s6  ;;  %p1057_p7 = scmp.lt.s32.totalorder %s1051_s6, %s1051_s6 }
  0x3b   :  { %959 = vmatpush1.bf16.msra.mxu0 %v958_v12  ;;  %v174_v44 = vstv %s1193_s28 }
  0x3c   :  { %927 = vmatprep.subr.mxu0 %v1088_v0  ;;  %vm175_vm2 = vcmp.lt.s32.totalorder %v170_v43, %v174_v44  ;;  %vm178_vm4 = vcmp.lt.s32.totalorder %v1163_v15, %v174_v44  ;;  %p1058_p8 = por %p1057_p7, %p1056_p6 }
  0x3d   :  { %v879_v45 = vsel %vm175_vm2, 1.0, %v1088_v0  ;;  %v1215_v58 = vsel %vm178_vm4, 1.0, %v1088_v0  ;;  %v517_v8 = vstv %s1219_s29 }
  0x3e   :  { %875 = vmatmul.mubr.msk.f32.vlgmr.msra.gmra.mrb[0].mxu0 %vm71_vm0, %v49_v13  ;;  %vm518_vm5 = vcmp.lt.s32.totalorder %v170_v43, %v517_v8  ;;  %vm521_vm6 = vcmp.lt.s32.totalorder %v1163_v15, %v517_v8  ;;  %p1059_p9 = pnand %p1058_p8, %p1052_p5 }
  0x3f   :  { %148 = vmatprep.mubr.f32.mxu0 %v1088_v0  ;;  %v888_v11 = vsel %vm518_vm5, 1.0, %v1088_v0 }
  0x42   :  { %876 = vmatmul.mubr.msk.f32.gmra.mrb[2].mxu0 %vm71_vm0, %v50_v25 }
  0x43   :  { %929 = vmatprep.mubr.msk.f32.mxu0 %vm1089_vm1, %v1088_v0 }
 0x111   :  { %v144_v19 = vpop.f32.mrb[0].mxu0 }
 0x112   :  { %v145_v20 = vadd.f32 %v144_v19, %v64_v18  ;;  %v146_v21 = vpop.f32.mrb[1].mxu0 }
 0x113   :  { %v1182_v31 = vadd.f32 %v146_v21, %v1177_v29 }
 0x114   :  { %v877_v22 = vmul.f32 -1.442695, %v145_v20 }
 0x115   :  { %v150_v32 = vpop.f32.mrb[2].mxu0 }
 0x116   :  { %973 = vpow2.f32 %v877_v22  ;;  %v151_v33 = vadd.f32 %v150_v32, %v64_v18  ;;  %v1189_v34 = vpop.f32.mrb[3].mxu0 }
 0x117   :  { %v153_v20 = vadd.f32 %v1189_v34, %v1177_v29 }
 0x118   :  { %v878_v35 = vmul.f32 -1.442695, %v151_v33 }
 0x120   :  { %v974_v23 = vpop.eup %973 }
 0x121   :  { %v161_v24 = vadd.f32 1.0, %v974_v23 }
 0x123   :  { %975 = vrcp.f32 %v161_v24 }
 0x124   :  { %977 = vpow2.f32 %v878_v35 }
 0x12d   :  { %v976_v26 = vpop.eup %975 }
 0x12e   :  { %346 = vrot.lane.b32.xlu1 %v976_v26, %s1090_s3  ;;  %182 = vrot.lane.b32.xlu0 %v976_v26, %s1091_s26  ;;  %v167_v27 = vmul.f32 0.17677669, %v976_v26  ;;  %v978_v36 = vpop.eup %977 }
 0x12f   :  { %v162_v37 = vadd.f32 1.0, %v978_v36 }
 0x131   :  { %979 = vrcp.f32 %v162_v37 }
 0x132   :  { %344 = vrot.lane.b32.xlu1 %v167_v27, %s1092_s27 }
 0x13b   :  { %v980_v38 = vpop.eup %979 }
 0x13c   :  { %525 = vrot.lane.b32.xlu1 %v980_v38, %s1091_s26  ;;  %v168_v39 = vmul.f32 0.17677669, %v980_v38 }
 0x140   :  { %689 = vrot.lane.b32.xlu1 %v980_v38, %s1090_s3  ;;  %v889_v38 = vsel %vm521_vm6, 1.0, %v1088_v0 }
 0x144   :  { %687 = vrot.lane.b32.xlu1 %v168_v39, %s1092_s27 }
 0x1a0   :  { %v183_v30 = vpop.permute.xlu0 %182  ;;  %v347_v51 = vpop.permute.xlu1 %346 }
 0x1a1   :  { %913 = vmatpush3.xpose.msk.msra.mxu1 %vm71_vm0, %v183_v30 }
 0x1a2   :  { %917 = vmatprep.subr.mxu1 %v1088_v0 }
 0x1a4   :  { %915 = vmatmul.mubr.msk.f32.vlgmr.msra.gmra.mrb[0].mxu1 %vm71_vm0, %v167_v27  ;;  %v345_v52 = vpop.permute.xlu1 %344 }
 0x1a5   :  { %918 = vmatpush3.msra.mxu1 %v1182_v31  ;;  %919 = vmatprep.mubr.msk.f32.mxu1 %vm1089_vm1, %v1088_v0 }
 0x1a6   :  { %922 = vmatprep.subr.mxu1 %v1088_v0 }
 0x1ae   :  { %v526_v55 = vpop.permute.xlu1 %525 }
 0x1b2   :  { %v690_v56 = vpop.permute.xlu1 %689 }
 0x1b6   :  { %v688_v57 = vpop.permute.xlu1 %687 }
 0x277   :  { %v255_v40 = vpop.f32.mrb[0].mxu1 }
 0x278   :  { %v259_v41 = vmul.f32 1.442695, %v255_v40  ;;  %v916_v42 = vpop.f32.mrb[1].mxu1 }
 0x27a   :  { %981 = vpow2.f32 %v259_v41 }
 0x284   :  { %v982_v46 = vpop.eup %981 }
 0x285   :  { %v261_v47 = vmul.f32 %v982_v46, %v879_v45 }
 0x287   :  { %v263_v48 = vsel %vm262_vm3, %v261_v47, 0.0 }
 0x288   :  { %264 = vadd.xlane.f32.xlu0 %v263_v48 }
 0x315   :  { %v265_v49 = vpop.xlane.xlu0 %264 }
 0x316   :  { %v266_v50 = vadd.f32 1e-08, %v265_v49 }
 0x318   :  { %983 = vrcp.f32 %v266_v50 }
 0x322   :  { %v984_v53 = vpop.eup %983 }
 0x323   :  { %v268_v54 = vmul.f32 %v984_v53, %v261_v47 }
 0x325   :  { %920 = vmatmul.mubr.msk.f32.vlgmr.msra.gmra.mrb[2].mxu1 %vm262_vm3, %v268_v54 }
 0x326   :  { %923 = vmatpush3.xpose.msk.msra.mxu1 %vm71_vm0, %v347_v51  ;;  %924 = vmatprep.mubr.msk.f32.mxu1 %vm1089_vm1, %v1088_v0 }
 0x327   :  { %932 = vmatprep.subr.mxu1 %v1088_v0 }
 0x329   :  { %925 = vmatmul.mubr.msk.f32.vlgmr.msra.gmra.mrb[4].mxu1 %vm71_vm0, %v345_v52 }
 0x32a   :  { %933 = vmatpush3.xpose.msk.msra.mxu1 %vm71_vm0, %v526_v55  ;;  %934 = vmatprep.mubr.msk.f32.mxu1 %vm1089_vm1, %v1088_v0 }
 0x32b   :  { %942 = vmatprep.subr.mxu1 %v1088_v0 }
 0x32d   :  { %935 = vmatmul.mubr.msk.f32.vlgmr.msra.gmra.mrb[6].mxu1 %vm71_vm0, %v168_v39 }
 0x32e   :  { %943 = vmatpush3.xpose.msk.msra.mxu1 %vm71_vm0, %v690_v56  ;;  %944 = vmatprep.mubr.msk.f32.mxu1 %vm1089_vm1, %v1088_v0 }
 0x331   :  { %945 = vmatmul.mubr.msk.f32.vlgmr.msra.gmra.mrb[8].mxu1 %vm71_vm0, %v688_v57 }
 0x3f8   :  { %v338_v59 = vpop.f32.mrb[2].mxu1 }
 0x3f9   :  { %v342_v60 = vmul.f32 %v1215_v58, %v338_v59  ;;  %v921_v61 = vpop.f32.mrb[3].mxu1 }
 0x3fb   :  { %343 = vst.msk [vmem:[#allocation9] sm:$0xff] %vm71_vm0, %v342_v60 }
 0x3fc   :  { %v418_v62 = vpop.f32.mrb[4].mxu1 }
 0x3fd   :  { %v422_v63 = vmul.f32 1.442695, %v418_v62  ;;  %v926_v1 = vpop.f32.mrb[5].mxu1 }
 0x3ff   :  { %985 = vpow2.f32 %v422_v63 }
 0x400   :  { %v598_v2 = vpop.f32.mrb[6].mxu1 }
 0x401   :  { %v602_v3 = vmul.f32 1.442695, %v598_v2  ;;  %v936_v4 = vpop.f32.mrb[7].mxu1 }
 0x403   :  { %987 = vpow2.f32 %v602_v3 }
 0x404   :  { %v761_v5 = vpop.f32.mrb[8].mxu1 }
 0x405   :  { %v765_v6 = vmul.f32 1.442695, %v761_v5  ;;  %v946_v7 = vpop.f32.mrb[9].mxu1 }
 0x407   :  { %989 = vpow2.f32 %v765_v6 }
 0x409   :  { %v986_v9 = vpop.eup %985 }
 0x40a   :  { %v424_v10 = vmul.f32 %v986_v9, %v879_v45 }
 0x40c   :  { %v425_v12 = vsel %vm262_vm3, %v424_v10, 0.0 }
 0x40d   :  { %v988_v13 = vpop.eup %987  ;;  %426 = vadd.xlane.f32.xlu1 %v425_v12 }
 0x40e   :  { %v604_v14 = vmul.f32 %v988_v13, %v888_v11 }
 0x410   :  { %v605_v16 = vsel %vm262_vm3, %v604_v14, 0.0 }
 0x411   :  { %v990_v17 = vpop.eup %989  ;;  %606 = vadd.xlane.f32.xlu0 %v605_v16 }
 0x412   :  { %v767_v18 = vmul.f32 %v990_v17, %v888_v11 }
 0x414   :  { %v768_v19 = vsel %vm262_vm3, %v767_v18, 0.0 }
 0x415   :  { %769 = vadd.xlane.f32.xlu0 %v768_v19 }
 0x41e   :  { %775 = vrot.lane.b32.xlu1 %v153_v20, %s1092_s27 }
 0x42b   :  { %432 = vrot.lane.b32.xlu0 %v1182_v31, %s1092_s27 }
 0x49a   :  { %v427_v21 = vpop.xlane.xlu1 %426 }
 0x49b   :  { %v428_v22 = vadd.f32 1e-08, %v427_v21 }
 0x49d   :  { %991 = vrcp.f32 %v428_v22 }
 0x49e   :  { %v607_v23 = vpop.xlane.xlu0 %606  ;;  %v776_v32 = vpop.permute.xlu1 %775 }
 0x49f   :  { %v608_v24 = vadd.f32 1e-08, %v607_v23 }
 0x4a1   :  { %993 = vrcp.f32 %v608_v24 }
 0x4a2   :  { %v770_v25 = vpop.xlane.xlu0 %769 }
 0x4a3   :  { %v771_v26 = vadd.f32 1e-08, %v770_v25 }
 0x4a5   :  { %995 = vrcp.f32 %v771_v26 }
 0x4a6   :  { %v433_v27 = vpop.permute.xlu0 %432 }
 0x4a7   :  { %v992_v28 = vpop.eup %991  ;;  %928 = vmatpush3.msra.mxu0 %v433_v27 }
 0x4a8   :  { %v430_v30 = vmul.f32 %v992_v28, %v424_v10  ;;  %937 = vmatprep.subr.mxu0 %v1088_v0 }
 0x4aa   :  { %930 = vmatmul.mubr.msk.f32.vlgmr.msra.gmra.mrb[4].mxu0 %vm262_vm3, %v430_v30 }
 0x4ab   :  { %v994_v29 = vpop.eup %993  ;;  %938 = vmatpush3.msra.mxu0 %v153_v20  ;;  %939 = vmatprep.mubr.msk.f32.mxu0 %vm1089_vm1, %v1088_v0 }
 0x4ac   :  { %947 = vmatprep.subr.mxu0 %v1088_v0  ;;  %v610_v31 = vmul.f32 %v994_v29, %v604_v14 }
 0x4ae   :  { %940 = vmatmul.mubr.msk.f32.vlgmr.msra.gmra.mrb[6].mxu0 %vm262_vm3, %v610_v31 }
 0x4af   :  { %v996_v33 = vpop.eup %995  ;;  %948 = vmatpush3.msra.mxu0 %v776_v32  ;;  %949 = vmatprep.mubr.msk.f32.mxu0 %vm1089_vm1, %v1088_v0 }
 0x4b0   :  { %v773_v34 = vmul.f32 %v996_v33, %v767_v18 }
 0x4b2   :  { %950 = vmatmul.mubr.msk.f32.vlgmr.msra.gmra.mrb[8].mxu0 %vm262_vm3, %v773_v34 }
 0x57d   :  { %v504_v35 = vpop.f32.mrb[4].mxu0 }
 0x57e   :  { %v508_v36 = vmul.f32 %v1215_v58, %v504_v35  ;;  %v931_v37 = vpop.f32.mrb[5].mxu0 }
 0x580   :  { %510 = vrot.lane.b32.xlu0 %v508_v36, %s1090_s3 }
 0x581   :  { %v680_v39 = vpop.f32.mrb[6].mxu0 }
 0x582   :  { %v684_v40 = vmul.f32 %v889_v38, %v680_v39  ;;  %v941_v41 = vpop.f32.mrb[7].mxu0 }
 0x584   :  { %686 = vst.msk [vmem:[#allocation9 + $0x8] sm:$0xff] %vm71_vm0, %v684_v40 }
 0x585   :  { %v847_v42 = vpop.f32.mrb[8].mxu0 }
 0x586   :  { %v851_v43 = vmul.f32 %v889_v38, %v847_v42  ;;  %v951_v44 = vpop.f32.mrb[9].mxu0 }
 0x588   :  { %853 = vrot.lane.b32.xlu0 %v851_v43, %s1090_s3 }
 0x5f2   :  { %v511_v15 = vpop.permute.xlu0 %510 }
 0x5f3   :  { %514 = vst.msk [vmem:[#allocation9] sm:$0xff] %vm513_vm7, %v511_v15 }
 0x5fa   :  { %v854_v45 = vpop.permute.xlu0 %853 }
 0x5fb   :  { %856 = vst.msk [vmem:[#allocation9 + $0x8] sm:$0xff] %vm513_vm7, %v854_v45 }
 0x5fc   :  { %1062 = shalt.err (!%p1059_p9)
}
 0x5fd   :  { %s1063_s10 = scalar_lea.hbm %s1265_s4, 256 }
 0x5fe   :  { %p1064_p10 = scmp.ne.s32.totalorder %s1265_s4, %s1063_s10  ;;  %p1067_p11 = scmp.lt.u32.totalorder %s1063_s10, %s1265_s4 }
 0x600   :  { %p1069_p12 = pnand %p1067_p11, %p1064_p10 }
 0x602   :  { %1072 = shalt.err (!%p1069_p12)
}
 0x603   :  { %868 = dma.vmem_to_hbm [thread:$0]  %s863_s5, 256, %s1265_s4, [#allocation6], %s1083_s8, %s1083_s8, %s1084_s9  }
 0x604   :  { %1079 = dma.done.wait [#allocation6], 256  }
 0x605   :  { %1080 = vsyncadd [#allocation6], 4294967040 }
 0x606   :  { %872 = vsyncpa [#allocation5], 1 }
 0x607   :  { %873 = vsyncpa [#allocation8], 1 }
 0x608   :  { %874 = vsyncpa [#allocation6], 1 }

</bundles_post_ra>
